<compile_context>
chip_gen: v7x
topology: tpu7x:2x2x1
jax: 0.10.0
libtpu: 0.0.40
codegen_flags: <defaults>
</compile_context>

<pallas_src>
import functools

import jax
import jax.numpy as jnp
from jax.experimental import pallas as pl
from jax.experimental.pallas import tpu as pltpu

STATE_DIM = 16
ACTION_DIM = 8
H1 = 400
H2 = 300
MAX_ACTION = 2.0

# Lane-aligned (padded) layer widths.
H1_PAD = 512    # 400 -> 512
H2_PAD = 384    # 300 -> 384
ACT_PAD = 128   # 8   -> 128 (lane-dense output store; sliced back to 8 outside)


def _round_up(x, m):
    return (x + m - 1) // m * m


def _pad2d(a, rows, cols):
    """Zero-pad a 2-D array up to (rows, cols)."""
    return jnp.pad(a, ((0, rows - a.shape[0]), (0, cols - a.shape[1])))


def policy_kernel(x_ref, w1_ref, b1_ref, w2_ref, b2_ref, w3_ref, b3_ref,
                  o_ref, *, max_action):
    mm_dtype = w1_ref.dtype           # matmul operand dtype (f32 or bf16)

    # fc1 + relu  (bias add / relu stay in f32 on the VPU)
    x = x_ref[...].astype(mm_dtype)
    h1 = jnp.dot(x, w1_ref[...], preferred_element_type=jnp.float32)
    h1 = jnp.maximum(h1 + b1_ref[...], 0.0)

    # fc2 + relu
    h2 = jnp.dot(h1.astype(mm_dtype), w2_ref[...],
                 preferred_element_type=jnp.float32)
    h2 = jnp.maximum(h2 + b2_ref[...], 0.0)

    # fc3 + tanh * max_action
    a = jnp.dot(h2.astype(mm_dtype), w3_ref[...],
                preferred_element_type=jnp.float32)
    a = jnp.tanh(a + b3_ref[...]) * max_action

    o_ref[...] = a.astype(o_ref.dtype)   # lane-dense (tb, 128) store


def policy_forward(state, params, max_action, *,
                   matmul_dtype=jnp.float32, tb_max=1024):
    """state: (B, STATE_DIM) f32. params: unpadded (in, out) weights, (1, out) biases."""
    B, sd = state.shape
    assert sd == STATE_DIM

    # Zero-pad weights/biases to lane-aligned shapes; cast only matmul operands.
    w1 = _pad2d(params["w1"], STATE_DIM, H1_PAD).astype(matmul_dtype)
    b1 = _pad2d(params["b1"], 1, H1_PAD).astype(jnp.float32)
    w2 = _pad2d(params["w2"], H1_PAD, H2_PAD).astype(matmul_dtype)
    b2 = _pad2d(params["b2"], 1, H2_PAD).astype(jnp.float32)
    w3 = _pad2d(params["w3"], H2_PAD, ACT_PAD).astype(matmul_dtype)
    b3 = _pad2d(params["b3"], 1, ACT_PAD).astype(jnp.float32)

    # Batch tile: multiple of 8 (f32 sublane), capped at tb_max; pad B to a
    # multiple of the tile so every grid step sees a full block.
    tb = min(tb_max, _round_up(max(B, 1), 8))
    Bp = _round_up(B, tb)
    x = state if Bp == B else jnp.pad(state, ((0, Bp - B), (0, 0)))

    grid = (Bp // tb,)

    def const_spec(shape):
        return pl.BlockSpec(shape, lambda i: (0,) * len(shape))

    out = pl.pallas_call(
        functools.partial(policy_kernel, max_action=max_action),
        out_shape=jax.ShapeDtypeStruct((Bp, ACT_PAD), jnp.float32),
        grid=grid,
        in_specs=[
            pl.BlockSpec((tb, STATE_DIM), lambda i: (i, 0)),   # batch-tiled state
            const_spec(w1.shape), const_spec(b1.shape),        # weights resident
            const_spec(w2.shape), const_spec(b2.shape),
            const_spec(w3.shape), const_spec(b3.shape),
        ],
        out_specs=pl.BlockSpec((tb, ACT_PAD), lambda i: (i, 0)),
        compiler_params=pltpu.CompilerParams(
            dimension_semantics=("parallel",),   # shard batch tiles across TCs (v7x)
        ),
    )(x, w1, b1, w2, b2, w3, b3)

    return out[:B, :ACTION_DIM]


def init_params(key):
    """Deterministic init mimicking nn.Linear default: U(-1/sqrt(fan_in), 1/sqrt(fan_in))."""
    ks = jax.random.split(key, 6)

    def linear(kw, kb, fan_in, fan_out):
        bound = 1.0 / jnp.sqrt(fan_in)
        w = jax.random.uniform(kw, (fan_in, fan_out), jnp.float32, -bound, bound)
        b = jax.random.uniform(kb, (1, fan_out), jnp.float32, -bound, bound)
        return w, b

    w1, b1 = linear(ks[0], ks[1], STATE_DIM, H1)
    w2, b2 = linear(ks[2], ks[3], H1, H2)
    w3, b3 = linear(ks[4], ks[5], H2, ACTION_DIM)
    return {"w1": w1, "b1": b1, "w2": w2, "b2": b2, "w3": w3, "b3": b3}


def policy_forward_ref(state, params, max_action):
    h1 = jnp.maximum(state @ params["w1"] + params["b1"], 0.0)
    h2 = jnp.maximum(h1 @ params["w2"] + params["b2"], 0.0)
    return jnp.tanh(h2 @ params["w3"] + params["b3"]) * max_action


if __name__ == "__main__":
    key = jax.random.PRNGKey(0)
    kp, kx = jax.random.split(key)
    params = init_params(kp)

    # --- small batch, exact f32 matmul path --------------------------------
    state = jax.random.normal(kx, (4, STATE_DIM), jnp.float32)
    out = jax.block_until_ready(policy_forward(state, params, MAX_ACTION))
    ref = policy_forward_ref(state, params, MAX_ACTION)
    assert out.shape == (4, ACTION_DIM)
    assert jnp.allclose(out, ref, atol=1e-5, rtol=1e-5)

    # --- multi-tile batch exercising the grid + bf16 MXU operands ----------
    state2 = jax.random.normal(jax.random.fold_in(kx, 1), (64, STATE_DIM),
                               jnp.float32)
    out2 = jax.block_until_ready(
        policy_forward(state2, params, MAX_ACTION,
                       matmul_dtype=jnp.bfloat16, tb_max=32))
    ref2 = policy_forward_ref(state2, params, MAX_ACTION)
    assert out2.shape == (64, ACTION_DIM)
    assert jnp.allclose(out2, ref2, atol=5e-2, rtol=5e-2)

    print("KERNEL_OK")
</pallas_src>

<mosaic_0001>
module attributes {stable_mosaic.version = 11 : i64} {
  func.func @policy_kernel(%arg0: i32, %arg1: memref<8x16xf32, #tpu.memory_space<vmem>>, %arg2: memref<16x512xf32, #tpu.memory_space<vmem>>, %arg3: memref<1x512xf32, #tpu.memory_space<vmem>>, %arg4: memref<512x384xf32, #tpu.memory_space<vmem>>, %arg5: memref<1x384xf32, #tpu.memory_space<vmem>>, %arg6: memref<384x128xf32, #tpu.memory_space<vmem>>, %arg7: memref<1x128xf32, #tpu.memory_space<vmem>>, %arg8: memref<8x128xf32, #tpu.memory_space<vmem>>) attributes {dimension_semantics = [#tpu.dimension_semantics<parallel>], iteration_bounds = array<i64: 1>, scalar_prefetch = 0 : i64, scratch_operands = 0 : i64, tpu.core_type = #tpu.core_type<tc>, window_params = [{transform_indices = @transform_0, window_bounds = array<i64: 8, 16>}, {pipeline_mode = #tpu.pipeline_mode<synchronous>, transform_indices = @transform_1, window_bounds = array<i64: 16, 512>}, {pipeline_mode = #tpu.pipeline_mode<synchronous>, transform_indices = @transform_2, window_bounds = array<i64: 1, 512>}, {pipeline_mode = #tpu.pipeline_mode<synchronous>, transform_indices = @transform_3, window_bounds = array<i64: 512, 384>}, {pipeline_mode = #tpu.pipeline_mode<synchronous>, transform_indices = @transform_4, window_bounds = array<i64: 1, 384>}, {pipeline_mode = #tpu.pipeline_mode<synchronous>, transform_indices = @transform_5, window_bounds = array<i64: 384, 128>}, {pipeline_mode = #tpu.pipeline_mode<synchronous>, transform_indices = @transform_6, window_bounds = array<i64: 1, 128>}, {transform_indices = @transform_7, window_bounds = array<i64: 8, 128>}]} {
    %c0 = arith.constant 0 : index
    %c0_0 = arith.constant 0 : index
    %0 = vector.load %arg1[%c0, %c0_0] : memref<8x16xf32, #tpu.memory_space<vmem>>, vector<8x16xf32>
    %c0_1 = arith.constant 0 : index
    %c0_2 = arith.constant 0 : index
    %1 = vector.load %arg2[%c0_1, %c0_2] : memref<16x512xf32, #tpu.memory_space<vmem>>, vector<16x512xf32>
    %cst = arith.constant dense<0.000000e+00> : vector<8x512xf32>
    %2 = tpu.matmul %0, %1, %cst {dimension_numbers = #tpu.dot_dimension_numbers<[1], [0], [0], [1], [0, 0, 1, 1], [], []>} : vector<8x16xf32>, vector<16x512xf32>, vector<8x512xf32> -> vector<8x512xf32>
    %c0_3 = arith.constant 0 : index
    %c0_4 = arith.constant 0 : index
    %3 = vector.load %arg3[%c0_3, %c0_4] : memref<1x512xf32, #tpu.memory_space<vmem>>, vector<1x512xf32>
    %4 = vector.broadcast %3 : vector<1x512xf32> to vector<8x512xf32>
    %5 = arith.addf %2, %4 : vector<8x512xf32>
    %cst_5 = arith.constant 0.000000e+00 : f32
    %6 = vector.broadcast %cst_5 : f32 to vector<8x512xf32>
    %7 = arith.maximumf %5, %6 : vector<8x512xf32>
    %c0_6 = arith.constant 0 : index
    %c0_7 = arith.constant 0 : index
    %8 = vector.load %arg4[%c0_6, %c0_7] : memref<512x384xf32, #tpu.memory_space<vmem>>, vector<512x384xf32>
    %cst_8 = arith.constant dense<0.000000e+00> : vector<8x384xf32>
    %9 = tpu.matmul %7, %8, %cst_8 {dimension_numbers = #tpu.dot_dimension_numbers<[1], [0], [0], [1], [0, 0, 1, 1], [], []>} : vector<8x512xf32>, vector<512x384xf32>, vector<8x384xf32> -> vector<8x384xf32>
    %c0_9 = arith.constant 0 : index
    %c0_10 = arith.constant 0 : index
    %10 = vector.load %arg5[%c0_9, %c0_10] : memref<1x384xf32, #tpu.memory_space<vmem>>, vector<1x384xf32>
    %11 = vector.broadcast %10 : vector<1x384xf32> to vector<8x384xf32>
    %12 = arith.addf %9, %11 : vector<8x384xf32>
    %cst_11 = arith.constant 0.000000e+00 : f32
    %13 = vector.broadcast %cst_11 : f32 to vector<8x384xf32>
    %14 = arith.maximumf %12, %13 : vector<8x384xf32>
    %c0_12 = arith.constant 0 : index
    %c0_13 = arith.constant 0 : index
    %15 = vector.load %arg6[%c0_12, %c0_13] : memref<384x128xf32, #tpu.memory_space<vmem>>, vector<384x128xf32>
    %cst_14 = arith.constant dense<0.000000e+00> : vector<8x128xf32>
    %16 = tpu.matmul %14, %15, %cst_14 {dimension_numbers = #tpu.dot_dimension_numbers<[1], [0], [0], [1], [0, 0, 1, 1], [], []>} : vector<8x384xf32>, vector<384x128xf32>, vector<8x128xf32> -> vector<8x128xf32>
    %c0_15 = arith.constant 0 : index
    %c0_16 = arith.constant 0 : index
    %17 = vector.load %arg7[%c0_15, %c0_16] : memref<1x128xf32, #tpu.memory_space<vmem>>, vector<1x128xf32>
    %18 = vector.broadcast %17 : vector<1x128xf32> to vector<8x128xf32>
    %19 = arith.addf %16, %18 : vector<8x128xf32>
    %20 = math.tanh %19 : vector<8x128xf32>
    %cst_17 = arith.constant 2.000000e+00 : f32
    %21 = vector.broadcast %cst_17 : f32 to vector<8x128xf32>
    %22 = arith.mulf %20, %21 : vector<8x128xf32>
    %c0_18 = arith.constant 0 : index
    %c0_19 = arith.constant 0 : index
    %23 = vector.load %arg8[%c0_18, %c0_19] : memref<8x128xf32, #tpu.memory_space<vmem>>, vector<8x128xf32>
    tpu.vector_store %arg8[%c0_18, %c0_19], %22 {strides = array<i32>} : memref<8x128xf32, #tpu.memory_space<vmem>>, vector<8x128xf32>,
    return
  }
  func.func @transform_0(%arg0: i32) -> (i32, i32) {
    %c0_i32 = arith.constant 0 : i32
    %c0_i32_0 = arith.constant 0 : i32
    return %arg0, %c0_i32 : i32, i32
  }
  func.func @transform_1(%arg0: i32) -> (i32, i32) {
    %c0_i32 = arith.constant 0 : i32
    %c0_i32_0 = arith.constant 0 : i32
    %c0_i32_1 = arith.constant 0 : i32
    return %c0_i32, %c0_i32_0 : i32, i32
  }
  func.func @transform_2(%arg0: i32) -> (i32, i32) {
    %c0_i32 = arith.constant 0 : i32
    %c0_i32_0 = arith.constant 0 : i32
    %c0_i32_1 = arith.constant 0 : i32
    return %c0_i32, %c0_i32_0 : i32, i32
  }
  func.func @transform_3(%arg0: i32) -> (i32, i32) {
    %c0_i32 = arith.constant 0 : i32
    %c0_i32_0 = arith.constant 0 : i32
    %c0_i32_1 = arith.constant 0 : i32
    return %c0_i32, %c0_i32_0 : i32, i32
  }
  func.func @transform_4(%arg0: i32) -> (i32, i32) {
    %c0_i32 = arith.constant 0 : i32
    %c0_i32_0 = arith.constant 0 : i32
    %c0_i32_1 = arith.constant 0 : i32
    return %c0_i32, %c0_i32_0 : i32, i32
  }
  func.func @transform_5(%arg0: i32) -> (i32, i32) {
    %c0_i32 = arith.constant 0 : i32
    %c0_i32_0 = arith.constant 0 : i32
    %c0_i32_1 = arith.constant 0 : i32
    return %c0_i32, %c0_i32_0 : i32, i32
  }
  func.func @transform_6(%arg0: i32) -> (i32, i32) {
    %c0_i32 = arith.constant 0 : i32
    %c0_i32_0 = arith.constant 0 : i32
    %c0_i32_1 = arith.constant 0 : i32
    return %c0_i32, %c0_i32_0 : i32, i32
  }
  func.func @transform_7(%arg0: i32) -> (i32, i32) {
    %c0_i32 = arith.constant 0 : i32
    %c0_i32_0 = arith.constant 0 : i32
    return %arg0, %c0_i32 : i32, i32
  }
}

</mosaic_0001>

<bundles_post_ra>
// kernel: tpu_custom_call.1
= control target key start
LH: loop header
LB: loop body
LE: loop exit
PB: predicated region body
PF: predicated region fallthrough
CT: control target
= control target key end

     0   :  { %12 = vsyncpa [#allocation3], 0  ;;  %s1682_s0 = inlined_call_operand.hbm [shape: f32[8,16], index: 0, kind: input, shape index: {}]   ;;  %s1683_s1 = inlined_call_operand.hbm [shape: f32[16,512], index: 1, kind: input, shape index: {}]   ;;  %s1684_s2 = inlined_call_operand.vmem [shape: f32[1,512], index: 2, kind: input, shape index: {}]   ;;  %s1685_s3 = inlined_call_operand.hbm [shape: f32[512,384], index: 3, kind: input, shape index: {}]   ;;  %s1686_s4 = inlined_call_operand.vmem [shape: f32[1,384], index: 4, kind: input, shape index: {}]   ;;  %s1687_s5 = inlined_call_operand.hbm [shape: f32[384,128], index: 5, kind: input, shape index: {}]   ;;  %s1688_s6 = inlined_call_operand.vmem [shape: f32[1,128], index: 6, kind: input, shape index: {}]   ;;  %s1689_s7 = inlined_call_operand.hbm [shape: f32[8,128], index: 7, kind: output, shape index: {}]  }
   0x1   :  { %13 = vsyncpa [#allocation6], 0 }
   0x2   :  { %14 = vsyncpa [#allocation9], 0 }
   0x3   :  { %15 = vsyncpa [#allocation4], 0  ;;  %s1524_s24 = smov [#allocation5]   ;;  %s1406_s28 = scalar_lea.hbm %s1683_s1, 1024 }
   0x4   :  { %s31_s25 = sshll.u32 %s1524_s24, 4  ;;  %p1407_p0 = scmp.ne.s32.totalorder %s1683_s1, %s1406_s28  ;;  %s32_s25 = int_to_ptr.vmem [resolvable:$true] %s31_s25 }
   0x5   :  { %p1410_p1 = scmp.lt.u32.totalorder %s1406_s28, %s1683_s1 }
   0x7   :  { %p1412_p2 = pnand %p1410_p1, %p1407_p0 }
   0x9   :  { %1415 = shalt.err (!%p1412_p2)
}
   0xa   :  { %s1416_s10 = scalar_lea.vmem %s32_s25, 1024  ;;  %p1421_p4 = scmp.lt.s32.totalorder %s32_s25, %s32_s25 }
   0xb   :  { %p1417_p3 = scmp.ne.s32.totalorder %s32_s25, %s1416_s10  ;;  %p1422_p5 = scmp.lt.s32.totalorder %s1416_s10, %s1416_s10 }
   0xd   :  { %p1423_p6 = por %p1422_p5, %p1421_p4 }
   0xf   :  { %p1424_p7 = pnand %p1423_p6, %p1417_p3 }
  0x11   :  { %1427 = shalt.err (!%p1424_p7)
}
  0x12   :  { %s1525_s11 = smov 512   ;;  %s1526_s12 = smov 32  }
  0x13   :  { %37 = dma.hbm_to_vmem [thread:$0]  %s1683_s1, 1024, %s32_s25, [#allocation6], %s1525_s11, %s1525_s11, %s1526_s12  }
  0x14   :  { %s1527_s15 = smov [#allocation2]   ;;  %s1528_s17 = smov [#allocation7]  }
  0x15   :  { %s22_s16 = sshll.u32 %s1527_s15, 4  ;;  %s45_s18 = sshll.u32 %s1528_s17, 4  ;;  %s23_s16 = int_to_ptr.vmem [resolvable:$true] %s22_s16  ;;  %s46_s18 = int_to_ptr.vmem [resolvable:$true] %s45_s18 }
  0x16   :  { %s1428_s21 = scalar_lea.hbm %s1682_s0, 128 }
  0x17   :  { %p1429_p8 = scmp.ne.s32.totalorder %s1682_s0, %s1428_s21  ;;  %p1432_p9 = scmp.lt.u32.totalorder %s1428_s21, %s1682_s0 }
  0x19   :  { %p1434_p10 = pnand %p1432_p9, %p1429_p8 }
  0x1b   :  { %1437 = shalt.err (!%p1434_p10)
}
  0x1c   :  { %s1438_s1 = scalar_lea.vmem %s23_s16, 128  ;;  %p1443_p12 = scmp.lt.s32.totalorder %s23_s16, %s23_s16 }
  0x1d   :  { %p1439_p11 = scmp.ne.s32.totalorder %s23_s16, %s1438_s1  ;;  %p1444_p13 = scmp.lt.s32.totalorder %s1438_s1, %s1438_s1 }
  0x1f   :  { %p1445_p0 = por %p1444_p13, %p1443_p12 }
  0x21   :  { %p1446_p1 = pnand %p1445_p0, %p1439_p11 }
  0x23   :  { %1449 = shalt.err (!%p1446_p1)
}
  0x24   :  { %25 = dma.hbm_to_vmem [thread:$0]  %s1682_s0, 128, %s23_s16, [#allocation3]  }
  0x25   :  { %s1450_s30 = scalar_lea.hbm %s1685_s3, 24576 }
  0x26   :  { %p1451_p2 = scmp.ne.s32.totalorder %s1685_s3, %s1450_s30  ;;  %p1454_p3 = scmp.lt.u32.totalorder %s1450_s30, %s1685_s3 }
  0x28   :  { %p1456_p4 = pnand %p1454_p3, %p1451_p2 }
  0x2a   :  { %1459 = shalt.err (!%p1456_p4)
}
  0x2b   :  { %s1460_s12 = scalar_lea.vmem %s46_s18, 24576  ;;  %p1465_p6 = scmp.lt.s32.totalorder %s46_s18, %s46_s18 }
  0x2c   :  { %p1461_p5 = scmp.ne.s32.totalorder %s46_s18, %s1460_s12  ;;  %p1466_p7 = scmp.lt.s32.totalorder %s1460_s12, %s1460_s12 }
  0x2e   :  { %p1467_p8 = por %p1466_p7, %p1465_p6 }
  0x30   :  { %p1468_p9 = pnand %p1467_p8, %p1461_p5 }
  0x32   :  { %1471 = shalt.err (!%p1468_p9)
}
  0x33   :  { %s1529_s0 = smov 384   ;;  %s1530_s13 = smov 24  }
  0x34   :  { %51 = dma.hbm_to_vmem [thread:$0]  %s1685_s3, 24576, %s46_s18, [#allocation6], %s1529_s0, %s1529_s0, %s1530_s13  }
  0x35   :  { %s1531_s16 = smov [#allocation8]   ;;  %s1472_s21 = scalar_lea.hbm %s1687_s5, 6144 }
  0x36   :  { %s59_s17 = sshll.u32 %s1531_s16, 4  ;;  %p1473_p10 = scmp.ne.s32.totalorder %s1687_s5, %s1472_s21  ;;  %s60_s17 = int_to_ptr.vmem [resolvable:$true] %s59_s17 }
  0x37   :  { %p1476_p11 = scmp.lt.u32.totalorder %s1472_s21, %s1687_s5 }
  0x39   :  { %p1478_p12 = pnand %p1476_p11, %p1473_p10 }
  0x3b   :  { %1481 = shalt.err (!%p1478_p12)
}
  0x3c   :  { %s1482_s1 = scalar_lea.vmem %s60_s17, 6144  ;;  %p1487_p0 = scmp.lt.s32.totalorder %s60_s17, %s60_s17 }
  0x3d   :  { %p1483_p13 = scmp.ne.s32.totalorder %s60_s17, %s1482_s1  ;;  %p1488_p1 = scmp.lt.s32.totalorder %s1482_s1, %s1482_s1 }
  0x3f   :  { %p1489_p2 = por %p1488_p1, %p1487_p0 }
  0x41   :  { %p1490_p3 = pnand %p1489_p2, %p1483_p13 }
  0x43   :  { %1493 = shalt.err (!%p1490_p3)
}
  0x44   :  { %s1532_s3 = smov 128   ;;  %s1533_s18 = smov 8  }
  0x45   :  { %65 = dma.hbm_to_vmem [thread:$0]  %s1687_s5, 6144, %s60_s17, [#allocation9], %s1532_s3, %s1532_s3, %s1533_s18  }
  0x46   :  { %1516 = dma.done.wait [#allocation3], 128  }
  0x47   :  { %1517 = vsyncadd [#allocation3], 4294967168 }
  0x48   :  { %1518 = dma.done.wait [#allocation6], 25600  }
  0x49   :  { %1519 = vsyncadd [#allocation6], 4294941696 }
  0x4a   :  { %1520 = dma.done.wait [#allocation9], 6144  }
  0x4b   :  { %1521 = vsyncadd [#allocation9], 4294961152  ;;  %v1534_v0 = vmov 0.0   ;;  %v82_v1 = vld [vmem:[#allocation5 + $0x8] sm:$0xff]  ;;  %v81_v3 = vld [vmem:[#allocation5] sm:$0xff]  ;;  %vm111_vm0 = vcmask 130048  }
  0x4c   :  { %179 = vmatprep.mubr.f32.mxu0 %v1534_v0  ;;  %250 = vmatprep.mubr.f32.mxu1 %v1534_v0  ;;  %v86_v2 = vld [vmem:[#allocation5 + $0x28] sm:$0xff]  ;;  %v85_v5 = vld [vmem:[#allocation5 + $0x20] sm:$0xff]  ;;  %v84_v6 = vld [vmem:[#allocation5 + $0x18] sm:$0xff]  ;;  %vm1536_vm1 = vmmov 0   ;;  %s1537_s8 = smov [#allocation10]  }
  0x4d   :  { %v1130_v4 = vpack.c.bf16 %v86_v2, %v82_v1  ;;  %v1132_v7 = vpack.c.bf16 %v85_v5, %v81_v3  ;;  %v80_v8 = vld [vmem:[#allocation2] sm:$0xff]  ;;  %v83_v10 = vld [vmem:[#allocation5 + $0x10] sm:$0xff]  ;;  %v262_v14 = vld [vmem:[#allocation7 + $0x8] sm:$0xff]  ;;  %s959_s9 = sshll.u32 %s1537_s8, 4  ;;  %s960_s9 = int_to_ptr.vmem [resolvable:$true] %s959_s9 }
  0x4e   :  { %v88_v9 = vld [vmem:[#allocation5 + $0x38] sm:$0xff]  ;;  %v87_v11 = vld [vmem:[#allocation5 + $0x30] sm:$0xff]  ;;  %v265_v15 = vld [vmem:[#allocation7 + $0x20] sm:$0xff]  ;;  %s1494_s10 = scalar_lea.vmem %s960_s9, 128  ;;  %p1499_p5 = scmp.lt.s32.totalorder %s960_s9, %s960_s9 }
  0x4f   :  { %1131 = vmatprep.subr.bf16.mxu0 %v1130_v4  ;;  %v1134_v12 = vpack.c.bf16 %v88_v9, %v84_v6  ;;  %v1136_v13 = vpack.c.bf16 %v87_v11, %v83_v10  ;;  %v261_v16 = vld [vmem:[#allocation7] sm:$0xff]  ;;  %v1138_v17 = vpack.c.bf16 %v265_v15, %v262_v14  ;;  %v264_v18 = vld [vmem:[#allocation7 + $0x18] sm:$0xff]  ;;  %v271_v20 = vld [vmem:[#allocation7 + $0x50] sm:$0xff]  ;;  %p1495_p4 = scmp.ne.s32.totalorder %s960_s9, %s1494_s10  ;;  %p1500_p6 = scmp.lt.s32.totalorder %s1494_s10, %s1494_s10 }
  0x50   :  { %1133 = vmatpush1.bf16.msra.mxu0 %v1132_v7  ;;  %v268_v19 = vld [vmem:[#allocation7 + $0x38] sm:$0xff]  ;;  %v1140_v21 = vpack.c.bf16 %v264_v18, %v261_v16  ;;  %v267_v23 = vld [vmem:[#allocation7 + $0x30] sm:$0xff]  ;;  %v270_v24 = vld [vmem:[#allocation7 + $0x48] sm:$0xff] }
  0x51   :  { %1135 = vmatprep.subr.bf16.mxu1 %v1134_v12  ;;  %v1142_v22 = vpack.c.bf16 %v271_v20, %v268_v19  ;;  %1139 = vmatprep.subr.bf16.mxu0 %v1138_v17  ;;  %v274_v25 = vld [vmem:[#allocation7 + $0x68] sm:$0xff]  ;;  %v277_v26 = vld [vmem:[#allocation7 + $0x80] sm:$0xff]  ;;  %v1144_v27 = vpack.c.bf16 %v270_v24, %v267_v23  ;;  %v276_v30 = vld [vmem:[#allocation7 + $0x78] sm:$0xff]  ;;  %p1501_p7 = por %p1500_p6, %p1499_p5 }
  0x52   :  { %1137 = vmatpush1.bf16.msra.mxu1 %v1136_v13  ;;  %v1146_v28 = vpack.c.bf16 %v277_v26, %v274_v25  ;;  %v273_v29 = vld [vmem:[#allocation7 + $0x60] sm:$0xff]  ;;  %v280_v31 = vld [vmem:[#allocation7 + $0x98] sm:$0xff]  ;;  %v283_v32 = vld [vmem:[#allocation7 + $0xb0] sm:$0xff] }
  0x53   :  { %970 = vmatmul.mubr.msk.f32.vlgmr.msra.gmra.mrb[0].mxu0 %vm111_vm0, %v80_v8  ;;  %v1148_v33 = vpack.c.bf16 %v276_v30, %v273_v29  ;;  %v1150_v34 = vpack.c.bf16 %v283_v32, %v280_v31  ;;  %v279_v35 = vld [vmem:[#allocation7 + $0x90] sm:$0xff]  ;;  %v282_v36 = vld [vmem:[#allocation7 + $0xa8] sm:$0xff]  ;;  %v289_v38 = vld [vmem:[#allocation7 + $0xe0] sm:$0xff]  ;;  %p1502_p8 = pnand %p1501_p7, %p1495_p4 }
  0x54   :  { %1141 = vmatpush1.bf16.msra.mxu0 %v1140_v21  ;;  %v286_v37 = vld [vmem:[#allocation7 + $0xc8] sm:$0xff]  ;;  %v311_v39 = vld [vmem:[#allocation7 + $0x190] sm:$0xff]  ;;  %v1152_v43 = vpack.c.bf16 %v282_v36, %v279_v35  ;;  %v285_v44 = vld [vmem:[#allocation7 + $0xc0] sm:$0xff] }
  0x55   :  { %971 = vmatmul.mubr.msk.f32.vlgmr.msra.gmra.mrb[0].mxu1 %vm111_vm0, %v80_v8  ;;  %1143 = vmatprep.subr.bf16.mxu0 %v1142_v22  ;;  %v314_v40 = vld [vmem:[#allocation7 + $0x1a8] sm:$0xff]  ;;  %v263_v42 = vld [vmem:[#allocation7 + $0x10] sm:$0xff]  ;;  %v288_v45 = vld [vmem:[#allocation7 + $0xd8] sm:$0xff]  ;;  %v1154_v47 = vpack.c.bf16 %v289_v38, %v286_v37 }
  0x56   :  { %v1266_v41 = vpack.c.bf16 %v314_v40, %v311_v39  ;;  %v266_v46 = vld [vmem:[#allocation7 + $0x28] sm:$0xff]  ;;  %v292_v48 = vld [vmem:[#allocation7 + $0xf8] sm:$0xff]  ;;  %v317_v50 = vld [vmem:[#allocation7 + $0x1c0] sm:$0xff]  ;;  %v1156_v58 = vpack.c.bf16 %v288_v45, %v285_v44 }
  0x57   :  { %v1268_v49 = vpack.c.bf16 %v266_v46, %v263_v42  ;;  %v320_v51 = vld [vmem:[#allocation7 + $0x1d8] sm:$0xff]  ;;  %v295_v52 = vld [vmem:[#allocation7 + $0x110] sm:$0xff]  ;;  %v269_v54 = vld [vmem:[#allocation7 + $0x40] sm:$0xff] }
  0x58   :  { %1145 = vmatpush1.bf16.msra.mxu0 %v1144_v27  ;;  %1267 = vmatprep.subr.bf16.mxu1 %v1266_v41  ;;  %v1270_v53 = vpack.c.bf16 %v320_v51, %v317_v50  ;;  %v272_v55 = vld [vmem:[#allocation7 + $0x58] sm:$0xff]  ;;  %v323_v57 = vld [vmem:[#allocation7 + $0x1f0] sm:$0xff]  ;;  %v294_v60 = vld [vmem:[#allocation7 + $0x108] sm:$0xff]  ;;  %v1158_v62 = vpack.c.bf16 %v295_v52, %v292_v48 }
  0x59   :  { %1147 = vmatprep.subr.bf16.mxu0 %v1146_v28  ;;  %1269 = vmatpush3.bf16.msra.mxu1 %v1268_v49  ;;  %v1272_v56 = vpack.c.bf16 %v272_v55, %v269_v54  ;;  %v291_v59 = vld [vmem:[#allocation7 + $0xf0] sm:$0xff]  ;;  %v326_v61 = vld [vmem:[#allocation7 + $0x208] sm:$0xff]  ;;  %v301_v4 = vld [vmem:[#allocation7 + $0x140] sm:$0xff] }
  0x5a   :  { %1271 = vmatprep.subr.bf16.mxu1 %v1270_v53  ;;  %v298_v63 = vld [vmem:[#allocation7 + $0x128] sm:$0xff]  ;;  %v1274_v1 = vpack.c.bf16 %v326_v61, %v323_v57  ;;  %v275_v2 = vld [vmem:[#allocation7 + $0x70] sm:$0xff]  ;;  %v329_v5 = vld [vmem:[#allocation7 + $0x220] sm:$0xff]  ;;  %v1160_v8 = vpack.c.bf16 %v294_v60, %v291_v59 }
  0x5b   :  { %v278_v3 = vld [vmem:[#allocation7 + $0x88] sm:$0xff]  ;;  %v332_v6 = vld [vmem:[#allocation7 + $0x238] sm:$0xff]  ;;  %v297_v9 = vld [vmem:[#allocation7 + $0x120] sm:$0xff]  ;;  %v1162_v13 = vpack.c.bf16 %v301_v4, %v298_v63 }
  0x5c   :  { %1149 = vmatpush1.bf16.msra.mxu0 %v1148_v33  ;;  %v1276_v7 = vpack.c.bf16 %v278_v3, %v275_v2  ;;  %v1278_v10 = vpack.c.bf16 %v332_v6, %v329_v5  ;;  %v281_v11 = vld [vmem:[#allocation7 + $0xa0] sm:$0xff]  ;;  %v284_v12 = vld [vmem:[#allocation7 + $0xb8] sm:$0xff]  ;;  %v335_v15 = vld [vmem:[#allocation7 + $0x250] sm:$0xff] }
  0x5d   :  { %1151 = vmatprep.subr.bf16.mxu0 %v1150_v34  ;;  %1273 = vmatpush3.bf16.msra.mxu1 %v1272_v56  ;;  %v300_v14 = vld [vmem:[#allocation7 + $0x138] sm:$0xff]  ;;  %v338_v16 = vld [vmem:[#allocation7 + $0x268] sm:$0xff]  ;;  %v307_v18 = vld [vmem:[#allocation7 + $0x170] sm:$0xff]  ;;  %v1280_v19 = vpack.c.bf16 %v284_v12, %v281_v11 }
  0x5e   :  { %1275 = vmatprep.subr.bf16.mxu1 %v1274_v1  ;;  %v304_v17 = vld [vmem:[#allocation7 + $0x158] sm:$0xff]  ;;  %v1164_v20 = vpack.c.bf16 %v300_v14, %v297_v9  ;;  %v303_v21 = vld [vmem:[#allocation7 + $0x150] sm:$0xff]  ;;  %v1282_v22 = vpack.c.bf16 %v338_v16, %v335_v15  ;;  %v290_v24 = vld [vmem:[#allocation7 + $0xe8] sm:$0xff] }
  0x5f   :  { %v287_v23 = vld [vmem:[#allocation7 + $0xd0] sm:$0xff]  ;;  %v1166_v25 = vpack.c.bf16 %v307_v18, %v304_v17  ;;  %v306_v26 = vld [vmem:[#allocation7 + $0x168] sm:$0xff]  ;;  %v341_v27 = vld [vmem:[#allocation7 + $0x280] sm:$0xff] }
  0x60   :  { %1153 = vmatpush1.bf16.msra.mxu0 %v1152_v43  ;;  %v344_v28 = vld [vmem:[#allocation7 + $0x298] sm:$0xff]  ;;  %v310_v29 = vld [vmem:[#allocation7 + $0x188] sm:$0xff]  ;;  %v313_v30 = vld [vmem:[#allocation7 + $0x1a0] sm:$0xff]  ;;  %v1284_v31 = vpack.c.bf16 %v290_v24, %v287_v23  ;;  %v1168_v32 = vpack.c.bf16 %v306_v26, %v303_v21 }
  0x61   :  { %1155 = vmatprep.subr.bf16.mxu0 %v1154_v47  ;;  %1277 = vmatpush3.bf16.msra.mxu1 %v1276_v7  ;;  %v309_v33 = vld [vmem:[#allocation7 + $0x180] sm:$0xff]  ;;  %v1286_v34 = vpack.c.bf16 %v344_v28, %v341_v27  ;;  %v296_v36 = vld [vmem:[#allocation7 + $0x118] sm:$0xff]  ;;  %v1170_v37 = vpack.c.bf16 %v313_v30, %v310_v29  ;;  %v347_v39 = vld [vmem:[#allocation7 + $0x2b0] sm:$0xff] }
  0x62   :  { %1279 = vmatprep.subr.bf16.mxu1 %v1278_v10  ;;  %v293_v35 = vld [vmem:[#allocation7 + $0x100] sm:$0xff]  ;;  %v312_v38 = vld [vmem:[#allocation7 + $0x198] sm:$0xff]  ;;  %v350_v40 = vld [vmem:[#allocation7 + $0x2c8] sm:$0xff] }
  0x63   :  { %v316_v41 = vld [vmem:[#allocation7 + $0x1b8] sm:$0xff]  ;;  %v319_v42 = vld [vmem:[#allocation7 + $0x1d0] sm:$0xff]  ;;  %v1288_v43 = vpack.c.bf16 %v296_v36, %v293_v35  ;;  %v1172_v44 = vpack.c.bf16 %v312_v38, %v309_v33  ;;  %v1290_v45 = vpack.c.bf16 %v350_v40, %v347_v39  ;;  %v302_v47 = vld [vmem:[#allocation7 + $0x148] sm:$0xff]  ;;  %v91_v38 = vlaneseq }
  0x64   :  { %1157 = vmatpush1.bf16.msra.mxu0 %v1156_v58  ;;  %v299_v46 = vld [vmem:[#allocation7 + $0x130] sm:$0xff]  ;;  %v1174_v48 = vpack.c.bf16 %v319_v42, %v316_v41  ;;  %v318_v50 = vld [vmem:[#allocation7 + $0x1c8] sm:$0xff]  ;;  %v325_v52 = vld [vmem:[#allocation7 + $0x200] sm:$0xff] }
  0x65   :  { %1159 = vmatprep.subr.bf16.mxu0 %v1158_v62  ;;  %1281 = vmatpush3.bf16.msra.mxu1 %v1280_v19  ;;  %v315_v49 = vld [vmem:[#allocation7 + $0x1b0] sm:$0xff]  ;;  %v322_v51 = vld [vmem:[#allocation7 + $0x1e8] sm:$0xff]  ;;  %v1292_v53 = vpack.c.bf16 %v302_v47, %v299_v46  ;;  %v321_v56 = vld [vmem:[#allocation7 + $0x1e0] sm:$0xff]  ;;  %v1630_v39 = vshrl.u32 %v91_v38, 7 }
  0x66   :  { %1283 = vmatprep.subr.bf16.mxu1 %v1282_v22  ;;  %v1176_v54 = vpack.c.bf16 %v318_v50, %v315_v49  ;;  %v1178_v55 = vpack.c.bf16 %v325_v52, %v322_v51  ;;  %v324_v57 = vld [vmem:[#allocation7 + $0x1f8] sm:$0xff]  ;;  %v331_v59 = vld [vmem:[#allocation7 + $0x230] sm:$0xff]  ;;  %v330_v63 = vld [vmem:[#allocation7 + $0x228] sm:$0xff] }
  0x67   :  { %v328_v58 = vld [vmem:[#allocation7 + $0x218] sm:$0xff]  ;;  %v1180_v60 = vpack.c.bf16 %v324_v57, %v321_v56  ;;  %v327_v62 = vld [vmem:[#allocation7 + $0x210] sm:$0xff]  ;;  %v334_v1 = vld [vmem:[#allocation7 + $0x248] sm:$0xff]  ;;  %v93_v40 = vsub.s32 0, %v1630_v39  ;;  %v97_v42 = vsub.s32 1, %v1630_v39 }
  0x68   :  { %1161 = vmatpush1.bf16.msra.mxu0 %v1160_v8  ;;  %v1182_v61 = vpack.c.bf16 %v331_v59, %v328_v58  ;;  %v337_v2 = vld [vmem:[#allocation7 + $0x260] sm:$0xff]  ;;  %v1184_v3 = vpack.c.bf16 %v330_v63, %v327_v62  ;;  %v336_v6 = vld [vmem:[#allocation7 + $0x258] sm:$0xff]  ;;  %v343_v8 = vld [vmem:[#allocation7 + $0x290] sm:$0xff] }
  0x69   :  { %1163 = vmatprep.subr.bf16.mxu0 %v1162_v13  ;;  %1285 = vmatpush3.bf16.msra.mxu1 %v1284_v31  ;;  %v1186_v4 = vpack.c.bf16 %v337_v2, %v334_v1  ;;  %v333_v5 = vld [vmem:[#allocation7 + $0x240] sm:$0xff]  ;;  %v340_v7 = vld [vmem:[#allocation7 + $0x278] sm:$0xff]  ;;  %v339_v11 = vld [vmem:[#allocation7 + $0x270] sm:$0xff] }
  0x6a   :  { %1287 = vmatprep.subr.bf16.mxu1 %v1286_v34  ;;  %v1188_v9 = vpack.c.bf16 %v336_v6, %v333_v5  ;;  %v1190_v10 = vpack.c.bf16 %v343_v8, %v340_v7  ;;  %v342_v12 = vld [vmem:[#allocation7 + $0x288] sm:$0xff]  ;;  %v349_v14 = vld [vmem:[#allocation7 + $0x2c0] sm:$0xff]  ;;  %v348_v18 = vld [vmem:[#allocation7 + $0x2b8] sm:$0xff] }
  0x6b   :  { %v346_v13 = vld [vmem:[#allocation7 + $0x2a8] sm:$0xff]  ;;  %v1192_v15 = vpack.c.bf16 %v342_v12, %v339_v11  ;;  %v345_v17 = vld [vmem:[#allocation7 + $0x2a0] sm:$0xff]  ;;  %v355_v21 = vld [vmem:[#allocation7 + $0x2f0] sm:$0xff] }
  0x6c   :  { %1165 = vmatpush1.bf16.msra.mxu0 %v1164_v20  ;;  %v1194_v16 = vpack.c.bf16 %v349_v14, %v346_v13  ;;  %v1196_v19 = vpack.c.bf16 %v348_v18, %v345_v17  ;;  %v352_v20 = vld [vmem:[#allocation7 + $0x2d8] sm:$0xff]  ;;  %v353_v22 = vld [vmem:[#allocation7 + $0x2e0] sm:$0xff]  ;;  %v354_v26 = vld [vmem:[#allocation7 + $0x2e8] sm:$0xff] }
  0x6d   :  { %1167 = vmatprep.subr.bf16.mxu0 %v1166_v25  ;;  %1289 = vmatpush3.bf16.msra.mxu1 %v1288_v43  ;;  %v1198_v23 = vpack.c.bf16 %v355_v21, %v352_v20  ;;  %v356_v24 = vld [vmem:[#allocation7 + $0x2f8] sm:$0xff]  ;;  %v351_v25 = vld [vmem:[#allocation7 + $0x2d0] sm:$0xff]  ;;  %v305_v29 = vld [vmem:[#allocation7 + $0x160] sm:$0xff]  ;;  %v105_v43 = vsub.s32 3, %v1630_v39 }
  0x6e   :  { %1291 = vmatprep.subr.bf16.mxu1 %v1290_v45  ;;  %v1294_v27 = vpack.c.bf16 %v356_v24, %v353_v22  ;;  %v1200_v28 = vpack.c.bf16 %v354_v26, %v351_v25  ;;  %v308_v30 = vld [vmem:[#allocation7 + $0x178] sm:$0xff]  ;;  %v361_v33 = vld [vmem:[#allocation7 + $0x320] sm:$0xff]  ;;  %v407_v34 = vld [vmem:[#allocation7 + $0x490] sm:$0xff] }
  0x6f   :  { %v1296_v31 = vpack.c.bf16 %v308_v30, %v305_v29  ;;  %v410_v36 = vld [vmem:[#allocation7 + $0x4a8] sm:$0xff]  ;;  %v1636_v41 = vld [vmem:[%s1684_s2] sm:$0xf]  ;;  %v357_v47 = vld [vmem:[#allocation7 + $0x300] sm:$0xff] }
  0x70   :  { %1169 = vmatpush1.bf16.msra.mxu0 %v1168_v32  ;;  %v358_v32 = vld [vmem:[#allocation7 + $0x308] sm:$0xff]  ;;  %v98_v45 = vrot.slane %v1636_v41, %v97_v42  ;;  %v106_v49 = vrot.slane %v1636_v41, %v105_v43  ;;  %v359_v52 = vld [vmem:[#allocation7 + $0x310] sm:$0xff]  ;;  %v413_v57 = vld [vmem:[#allocation7 + $0x4c0] sm:$0xff] }
  0x71   :  { %1171 = vmatprep.subr.bf16.mxu0 %v1170_v37  ;;  %1293 = vmatpush3.bf16.msra.mxu1 %v1292_v53  ;;  %v1202_v35 = vpack.c.bf16 %v361_v33, %v358_v32  ;;  %v1298_v37 = vpack.c.bf16 %v410_v36, %v407_v34  ;;  %v362_v53 = vld [vmem:[#allocation7 + $0x328] sm:$0xff]  ;;  %v367_v56 = vld [vmem:[#allocation7 + $0x350] sm:$0xff]  ;;  %v416_v58 = vld [vmem:[#allocation7 + $0x4d8] sm:$0xff] }
  0x72   :  { %1295 = vmatprep.subr.bf16.mxu1 %v1294_v27  ;;  %v1300_v63 = vpack.c.bf16 %v362_v53, %v359_v52  ;;  %v363_v1 = vld [vmem:[#allocation7 + $0x330] sm:$0xff]  ;;  %v366_v2 = vld [vmem:[#allocation7 + $0x348] sm:$0xff]  ;;  %v1302_v6 = vpack.c.bf16 %v416_v58, %v413_v57  ;;  %v365_v7 = vld [vmem:[#allocation7 + $0x340] sm:$0xff] }
  0x73   :  { %v368_v8 = vld [vmem:[#allocation7 + $0x358] sm:$0xff]  ;;  %v419_v11 = vld [vmem:[#allocation7 + $0x4f0] sm:$0xff]  ;;  %v422_v12 = vld [vmem:[#allocation7 + $0x508] sm:$0xff]  ;;  %v1208_v14 = vpack.c.bf16 %v366_v2, %v363_v1 }
  0x74   :  { %1173 = vmatpush1.bf16.msra.mxu0 %v1172_v44  ;;  %v94_v44 = vrot.slane %v1636_v41, %v93_v40  ;;  %v372_v17 = vld [vmem:[#allocation7 + $0x378] sm:$0xff]  ;;  %v371_v20 = vld [vmem:[#allocation7 + $0x370] sm:$0xff]  ;;  %v374_v21 = vld [vmem:[#allocation7 + $0x388] sm:$0xff] }
  0x75   :  { %1175 = vmatprep.subr.bf16.mxu0 %v1174_v48  ;;  %1297 = vmatpush3.bf16.msra.mxu1 %v1296_v31  ;;  %v360_v48 = vld [vmem:[#allocation7 + $0x318] sm:$0xff]  ;;  %v425_v24 = vld [vmem:[#allocation7 + $0x520] sm:$0xff]  ;;  %v1308_v27 = vpack.c.bf16 %v374_v21, %v371_v20  ;;  %v378_v29 = vld [vmem:[#allocation7 + $0x3a8] sm:$0xff] }
  0x76   :  { %1299 = vmatprep.subr.bf16.mxu1 %v1298_v37  ;;  %v1204_v62 = vpack.c.bf16 %v360_v48, %v357_v47  ;;  %v376_v22 = vld [vmem:[#allocation7 + $0x398] sm:$0xff]  ;;  %v377_v32 = vld [vmem:[#allocation7 + $0x3a0] sm:$0xff]  ;;  %v382_v34 = vld [vmem:[#allocation7 + $0x3c8] sm:$0xff] }
  0x77   :  { %v428_v25 = vld [vmem:[#allocation7 + $0x538] sm:$0xff]  ;;  %v431_v36 = vld [vmem:[#allocation7 + $0x550] sm:$0xff]  ;;  %v434_v37 = vld [vmem:[#allocation7 + $0x568] sm:$0xff] }
  0x78   :  { %1177 = vmatpush1.bf16.msra.mxu0 %v1176_v54  ;;  %v364_v54 = vld [vmem:[#allocation7 + $0x338] sm:$0xff]  ;;  %v1310_v31 = vpack.c.bf16 %v428_v25, %v425_v24  ;;  %v1314_v47 = vpack.c.bf16 %v434_v37, %v431_v36  ;;  %v383_v48 = vld [vmem:[#allocation7 + $0x3d0] sm:$0xff]  ;;  %v437_v52 = vld [vmem:[#allocation7 + $0x580] sm:$0xff] }
  0x79   :  { %1179 = vmatprep.subr.bf16.mxu0 %v1178_v55  ;;  %v1206_v5 = vpack.c.bf16 %v367_v56, %v364_v54  ;;  %v380_v33 = vld [vmem:[#allocation7 + $0x3b8] sm:$0xff]  ;;  %v387_v56 = vld [vmem:[#allocation7 + $0x3f0] sm:$0xff]  ;;  %v390_v57 = vld [vmem:[#allocation7 + $0x408] sm:$0xff] }
  0x7a   :  { %v1312_v43 = vpack.c.bf16 %v380_v33, %v377_v32  ;;  %v440_v53 = vld [vmem:[#allocation7 + $0x598] sm:$0xff]  ;;  %v397_v1 = vld [vmem:[#allocation7 + $0x440] sm:$0xff]  ;;  %v443_v2 = vld [vmem:[#allocation7 + $0x5b0] sm:$0xff] }
  0x7b   :  { %v399_v20 = vld [vmem:[#allocation7 + $0x450] sm:$0xff]  ;;  %v401_v24 = vld [vmem:[#allocation7 + $0x460] sm:$0xff]  ;;  %v404_v25 = vld [vmem:[#allocation7 + $0x478] sm:$0xff] }
  0x7c   :  { %1181 = vmatpush1.bf16.msra.mxu0 %v1180_v60  ;;  %v408_v32 = vld [vmem:[#allocation7 + $0x498] sm:$0xff] }
  0x7d   :  { %1183 = vmatprep.subr.bf16.mxu0 %v1182_v61  ;;  %v412_v33 = vld [vmem:[#allocation7 + $0x4b8] sm:$0xff] }
  0x80   :  { %1185 = vmatpush1.bf16.msra.mxu0 %v1184_v3 }
  0x81   :  { %1187 = vmatprep.subr.bf16.mxu0 %v1186_v4 }
  0x84   :  { %1189 = vmatpush1.bf16.msra.mxu0 %v1188_v9  ;;  %v370_v9 = vld [vmem:[#allocation7 + $0x368] sm:$0xff] }
  0x85   :  { %1191 = vmatprep.subr.bf16.mxu0 %v1190_v10  ;;  %v373_v10 = vld [vmem:[#allocation7 + $0x380] sm:$0xff] }
  0x86   :  { %v1210_v18 = vpack.c.bf16 %v373_v10, %v370_v9 }
  0x88   :  { %1193 = vmatpush1.bf16.msra.mxu0 %v1192_v15  ;;  %v1304_v15 = vpack.c.bf16 %v368_v8, %v365_v7  ;;  %v393_v7 = vld [vmem:[#allocation7 + $0x420] sm:$0xff]  ;;  %v396_v8 = vld [vmem:[#allocation7 + $0x438] sm:$0xff] }
  0x89   :  { %1195 = vmatprep.subr.bf16.mxu0 %v1194_v16  ;;  %v369_v16 = vld [vmem:[#allocation7 + $0x360] sm:$0xff] }
  0x8a   :  { %v1212_v26 = vpack.c.bf16 %v372_v17, %v369_v16  ;;  %v452_v16 = vld [vmem:[#allocation7 + $0x5f8] sm:$0xff] }
  0x8c   :  { %1197 = vmatpush1.bf16.msra.mxu0 %v1196_v19  ;;  %v1306_v19 = vpack.c.bf16 %v422_v12, %v419_v11  ;;  %v395_v11 = vld [vmem:[#allocation7 + $0x430] sm:$0xff]  ;;  %v398_v12 = vld [vmem:[#allocation7 + $0x448] sm:$0xff] }
  0x8d   :  { %1199 = vmatprep.subr.bf16.mxu0 %v1198_v23  ;;  %v379_v23 = vld [vmem:[#allocation7 + $0x3b0] sm:$0xff] }
  0x8e   :  { %v1214_v30 = vpack.c.bf16 %v379_v23, %v376_v22  ;;  %v402_v23 = vld [vmem:[#allocation7 + $0x468] sm:$0xff] }
  0x90   :  { %1201 = vmatpush1.bf16.msra.mxu0 %v1200_v28  ;;  %v375_v28 = vld [vmem:[#allocation7 + $0x390] sm:$0xff] }
  0x91   :  { %1203 = vmatprep.subr.bf16.mxu0 %v1202_v35  ;;  %v385_v35 = vld [vmem:[#allocation7 + $0x3e0] sm:$0xff]  ;;  %v1216_v38 = vpack.c.bf16 %v378_v29, %v375_v28  ;;  %v1328_v29 = vpack.c.bf16 %v404_v25, %v401_v24  ;;  %v773_v25 = vld [vmem:[#allocation8 + $0x90] sm:$0xff] }
 0x126   :  { %v181_v46 = vpop.f32.mrb[0].mxu0 }
 0x127   :  { %v182_v50 = vadd.f32 %v181_v46, %v94_v44  ;;  %v183_v51 = vpop.f32.mrb[1].mxu0  ;;  %v381_v44 = vld [vmem:[#allocation7 + $0x3c0] sm:$0xff]  ;;  %v1218_v46 = vpack.c.bf16 %v385_v35, %v382_v34  ;;  %v415_v34 = vld [vmem:[#allocation7 + $0x4d0] sm:$0xff] }
 0x128   :  { %v184_v55 = vadd.f32 %v183_v51, %v98_v45  ;;  %v1647_v59 = vpop.f32.mrb[0].mxu1  ;;  %v384_v45 = vld [vmem:[#allocation7 + $0x3d8] sm:$0xff]  ;;  %v391_v51 = vld [vmem:[#allocation7 + $0x410] sm:$0xff]  ;;  %v1238_v37 = vpack.c.bf16 %v415_v34, %v412_v33  ;;  %v759_v33 = vld [vmem:[#allocation8 + $0x20] sm:$0xff] }
 0x129   :  { %v254_v60 = vpop.f32.mrb[1].mxu1  ;;  %v257_v4 = vmax.f32 %v182_v50, 0.0  ;;  %v388_v50 = vld [vmem:[#allocation7 + $0x3f8] sm:$0xff]  ;;  %v1220_v54 = vpack.c.bf16 %v384_v45, %v381_v44  ;;  %v421_v44 = vld [vmem:[#allocation7 + $0x500] sm:$0xff]  ;;  %v760_v34 = vld [vmem:[#allocation8 + $0x28] sm:$0xff] }
 0x12a   :  { %v258_v61 = vmax.f32 %v184_v55, 0.0  ;;  %v255_v3 = vadd.f32 %v254_v60, %v106_v49  ;;  %v386_v49 = vld [vmem:[#allocation7 + $0x3e8] sm:$0xff]  ;;  %v1222_v58 = vpack.c.bf16 %v391_v51, %v388_v50  ;;  %v1318_v60 = vpack.c.bf16 %v440_v53, %v437_v52  ;;  %v427_v50 = vld [vmem:[#allocation7 + $0x530] sm:$0xff] }
 0x12b   :  { %v1316_v55 = vpack.c.bf16 %v386_v49, %v383_v48  ;;  %v420_v48 = vld [vmem:[#allocation7 + $0x4f8] sm:$0xff]  ;;  %v423_v53 = vld [vmem:[#allocation7 + $0x510] sm:$0xff] }
 0x12c   :  { %534 = vmatprep.mubr.f32.mxu0 %v258_v61  ;;  %676 = vmatprep.mubr.f32.mxu1 %v258_v61  ;;  %v260_v13 = vmax.f32 %v255_v3, 0.0  ;;  %v389_v61 = vld [vmem:[#allocation7 + $0x400] sm:$0xff]  ;;  %v446_v3 = vld [vmem:[#allocation7 + $0x5c8] sm:$0xff]  ;;  %v424_v49 = vld [vmem:[#allocation7 + $0x518] sm:$0xff] }
 0x12d   :  { %535 = vmatmul.mubr.f32.vlgmr.msra.gmra.mrb[2].mxu0 %v257_v4  ;;  %677 = vmatmul.mubr.f32.vlgmr.msra.gmra.mrb[2].mxu1 %v257_v4  ;;  %v101_v4 = vsub.s32 2, %v1630_v39  ;;  %v1322_v10 = vpack.c.bf16 %v446_v3, %v443_v2  ;;  %v1246_v52 = vpack.c.bf16 %v427_v50, %v424_v49  ;;  %v435_v3 = vld [vmem:[#allocation7 + $0x570] sm:$0xff]  ;;  %v764_v49 = vld [vmem:[#allocation8 + $0x48] sm:$0xff]  ;;  %v791_v39 = vld [vmem:[#allocation8 + $0x120] sm:$0xff] }
 0x12e   :  { %1205 = vmatpush1.bf16.msra.mxu0 %v1204_v62  ;;  %1301 = vmatpush3.bf16.msra.mxu1 %v1300_v63  ;;  %v392_v62 = vld [vmem:[#allocation7 + $0x418] sm:$0xff]  ;;  %v394_v63 = vld [vmem:[#allocation7 + $0x428] sm:$0xff]  ;;  %v781_v50 = vld [vmem:[#allocation8 + $0xd0] sm:$0xff] }
 0x12f   :  { %1207 = vmatprep.subr.bf16.mxu0 %v1206_v5  ;;  %1303 = vmatprep.subr.bf16.mxu1 %v1302_v6  ;;  %v1224_v5 = vpack.c.bf16 %v390_v57, %v387_v56  ;;  %v1320_v6 = vpack.c.bf16 %v392_v62, %v389_v61  ;;  %v1226_v9 = vpack.c.bf16 %v397_v1, %v394_v63  ;;  %v433_v56 = vld [vmem:[#allocation7 + $0x560] sm:$0xff]  ;;  %v432_v61 = vld [vmem:[#allocation7 + $0x558] sm:$0xff]  ;;  %v439_v63 = vld [vmem:[#allocation7 + $0x590] sm:$0xff] }
 0x130   :  { %746 = vmatprep.mubr.f32.mxu1 %v260_v13  ;;  %605 = vmatprep.mubr.f32.mxu0 %v260_v13  ;;  %v400_v13 = vld [vmem:[#allocation7 + $0x458] sm:$0xff]  ;;  %v102_v17 = vrot.slane %v1636_v41, %v101_v4  ;;  %v1232_v41 = vpack.c.bf16 %v402_v23, %v399_v20  ;;  %v772_v20 = vld [vmem:[#allocation8 + $0x88] sm:$0xff] }
 0x131   :  { %v436_v62 = vld [vmem:[#allocation7 + $0x578] sm:$0xff]  ;;  %v756_v23 = vld [vmem:[#allocation8 + $0x8] sm:$0xff] }
 0x132   :  { %1209 = vmatpush1.bf16.msra.mxu0 %v1208_v14  ;;  %1305 = vmatpush3.bf16.msra.mxu1 %v1304_v15  ;;  %v403_v14 = vld [vmem:[#allocation7 + $0x470] sm:$0xff]  ;;  %v449_v15 = vld [vmem:[#allocation7 + $0x5e0] sm:$0xff]  ;;  %v1654_v28 = vadd.f32 %v1647_v59, %v102_v17  ;;  %v1254_v2 = vpack.c.bf16 %v439_v63, %v436_v62  ;;  %v450_v17 = vld [vmem:[#allocation7 + $0x5e8] sm:$0xff] }
 0x133   :  { %1211 = vmatprep.subr.bf16.mxu0 %v1210_v18  ;;  %1307 = vmatprep.subr.bf16.mxu1 %v1306_v19  ;;  %v1228_v18 = vpack.c.bf16 %v396_v8, %v393_v7  ;;  %v1324_v19 = vpack.c.bf16 %v398_v12, %v395_v11  ;;  %v1230_v21 = vpack.c.bf16 %v403_v14, %v400_v13  ;;  %v411_v59 = vld [vmem:[#allocation7 + $0x4b0] sm:$0xff]  ;;  %v445_v7 = vld [vmem:[#allocation7 + $0x5c0] sm:$0xff]  ;;  %v444_v11 = vld [vmem:[#allocation7 + $0x5b8] sm:$0xff] }
 0x134   :  { %v1326_v22 = vpack.c.bf16 %v452_v16, %v449_v15  ;;  %v259_v35 = vmax.f32 %v1654_v28, 0.0  ;;  %v448_v12 = vld [vmem:[#allocation7 + $0x5d8] sm:$0xff]  ;;  %v451_v13 = vld [vmem:[#allocation7 + $0x5f0] sm:$0xff]  ;;  %v768_v62 = vld [vmem:[#allocation8 + $0x68] sm:$0xff] }
 0x135   :  { %v1262_v15 = vpack.c.bf16 %v451_v13, %v448_v12  ;;  %v447_v16 = vld [vmem:[#allocation7 + $0x5d0] sm:$0xff]  ;;  %v453_v12 = vld [vmem:[%s1686_s4] sm:$0x7] }
 0x136   :  { %1213 = vmatpush1.bf16.msra.mxu0 %v1212_v26  ;;  %1309 = vmatpush3.bf16.msra.mxu1 %v1308_v27  ;;  %v406_v26 = vld [vmem:[#allocation7 + $0x488] sm:$0xff]  ;;  %v409_v27 = vld [vmem:[#allocation7 + $0x4a0] sm:$0xff]  ;;  %v466_v13 = vrot.slane %v453_v12, %v101_v4 }
 0x137   :  { %1215 = vmatprep.subr.bf16.mxu0 %v1214_v30  ;;  %1311 = vmatprep.subr.bf16.mxu1 %v1310_v31  ;;  %v1234_v30 = vpack.c.bf16 %v409_v27, %v406_v26  ;;  %v405_v31 = vld [vmem:[#allocation7 + $0x480] sm:$0xff]  ;;  %v774_v26 = vld [vmem:[#allocation8 + $0x98] sm:$0xff]  ;;  %v757_v27 = vld [vmem:[#allocation8 + $0x10] sm:$0xff] }
 0x138   :  { %v1236_v36 = vpack.c.bf16 %v408_v32, %v405_v31  ;;  %v1334_v28 = vpack.c.bf16 %v774_v26, %v773_v25  ;;  %v788_v25 = vld [vmem:[#allocation8 + $0x108] sm:$0xff] }
 0x13a   :  { %1217 = vmatpush1.bf16.msra.mxu0 %v1216_v38  ;;  %1313 = vmatpush3.bf16.msra.mxu1 %v1312_v43  ;;  %v414_v38 = vld [vmem:[#allocation7 + $0x4c8] sm:$0xff] }
 0x13b   :  { %1219 = vmatprep.subr.bf16.mxu0 %v1218_v46  ;;  %1315 = vmatprep.subr.bf16.mxu1 %v1314_v47  ;;  %v418_v43 = vld [vmem:[#allocation7 + $0x4e8] sm:$0xff]  ;;  %v1240_v45 = vpack.c.bf16 %v414_v38, %v411_v59  ;;  %v417_v47 = vld [vmem:[#allocation7 + $0x4e0] sm:$0xff]  ;;  %v761_v38 = vld [vmem:[#allocation8 + $0x30] sm:$0xff] }
 0x13c   :  { %v1242_v46 = vpack.c.bf16 %v421_v44, %v418_v43  ;;  %v1244_v51 = vpack.c.bf16 %v420_v48, %v417_v47  ;;  %v762_v43 = vld [vmem:[#allocation8 + $0x38] sm:$0xff]  ;;  %v779_v44 = vld [vmem:[#allocation8 + $0xc0] sm:$0xff] }
 0x13d   :  { %v763_v48 = vld [vmem:[#allocation8 + $0x40] sm:$0xff] }
 0x13e   :  { %1221 = vmatpush1.bf16.msra.mxu0 %v1220_v54  ;;  %1317 = vmatpush3.bf16.msra.mxu1 %v1316_v55  ;;  %v426_v54 = vld [vmem:[#allocation7 + $0x528] sm:$0xff] }
 0x13f   :  { %1223 = vmatprep.subr.bf16.mxu0 %v1222_v58  ;;  %1319 = vmatprep.subr.bf16.mxu1 %v1318_v60  ;;  %v430_v55 = vld [vmem:[#allocation7 + $0x548] sm:$0xff]  ;;  %v1248_v57 = vpack.c.bf16 %v426_v54, %v423_v53  ;;  %v429_v60 = vld [vmem:[#allocation7 + $0x540] sm:$0xff]  ;;  %v765_v54 = vld [vmem:[#allocation8 + $0x50] sm:$0xff] }
 0x140   :  { %v1250_v58 = vpack.c.bf16 %v433_v56, %v430_v55  ;;  %v1252_v1 = vpack.c.bf16 %v432_v61, %v429_v60  ;;  %v766_v55 = vld [vmem:[#allocation8 + $0x58] sm:$0xff]  ;;  %v783_v56 = vld [vmem:[#allocation8 + $0xe0] sm:$0xff] }
 0x141   :  { %v767_v61 = vld [vmem:[#allocation8 + $0x60] sm:$0xff] }
 0x142   :  { %1225 = vmatpush1.bf16.msra.mxu0 %v1224_v5  ;;  %1321 = vmatpush3.bf16.msra.mxu1 %v1320_v6  ;;  %v438_v5 = vld [vmem:[#allocation7 + $0x588] sm:$0xff]  ;;  %v1356_v63 = vpack.c.bf16 %v768_v62, %v767_v61 }
 0x143   :  { %1227 = vmatprep.subr.bf16.mxu0 %v1226_v9  ;;  %1323 = vmatprep.subr.bf16.mxu1 %v1322_v10  ;;  %v442_v6 = vld [vmem:[#allocation7 + $0x5a8] sm:$0xff]  ;;  %v1256_v8 = vpack.c.bf16 %v438_v5, %v435_v3  ;;  %v441_v10 = vld [vmem:[#allocation7 + $0x5a0] sm:$0xff]  ;;  %v769_v5 = vld [vmem:[#allocation8 + $0x70] sm:$0xff] }
 0x144   :  { %v1258_v9 = vpack.c.bf16 %v445_v7, %v442_v6  ;;  %v1260_v14 = vpack.c.bf16 %v444_v11, %v441_v10  ;;  %v770_v6 = vld [vmem:[#allocation8 + $0x78] sm:$0xff] }
 0x145   :  { %v1360_v7 = vpack.c.bf16 %v770_v6, %v769_v5 }
 0x146   :  { %1229 = vmatpush1.bf16.msra.mxu0 %v1228_v18  ;;  %1325 = vmatpush3.bf16.msra.mxu1 %v1324_v19  ;;  %v1264_v18 = vpack.c.bf16 %v450_v17, %v447_v16  ;;  %v771_v19 = vld [vmem:[#allocation8 + $0x80] sm:$0xff] }
 0x147   :  { %1231 = vmatprep.subr.bf16.mxu0 %v1230_v21  ;;  %1327 = vmatprep.subr.bf16.mxu1 %v1326_v22  ;;  %v1330_v21 = vpack.c.bf16 %v772_v20, %v771_v19  ;;  %v755_v22 = vld [vmem:[#allocation8] sm:$0xff]  ;;  %v458_v19 = vrot.slane %v453_v12, %v93_v40  ;;  %v462_v20 = vrot.slane %v453_v12, %v97_v42  ;;  %v792_v40 = vld [vmem:[#allocation8 + $0x128] sm:$0xff] }
 0x148   :  { %v1332_v24 = vpack.c.bf16 %v756_v23, %v755_v22  ;;  %v1369_v42 = vpack.c.bf16 %v792_v40, %v791_v39 }
 0x14a   :  { %1233 = vmatpush1.bf16.msra.mxu0 %v1232_v41  ;;  %1329 = vmatpush3.bf16.msra.mxu1 %v1328_v29  ;;  %v758_v41 = vld [vmem:[#allocation8 + $0x18] sm:$0xff]  ;;  %v775_v29 = vld [vmem:[#allocation8 + $0xa0] sm:$0xff] }
 0x14b   :  { %1235 = vmatprep.subr.bf16.mxu0 %v1234_v30  ;;  %1331 = vmatprep.subr.bf16.mxu1 %v1330_v21  ;;  %v776_v30 = vld [vmem:[#allocation8 + $0xa8] sm:$0xff]  ;;  %v1336_v31 = vpack.c.bf16 %v758_v41, %v757_v27  ;;  %v789_v41 = vld [vmem:[#allocation8 + $0x110] sm:$0xff] }
 0x14c   :  { %v1338_v32 = vpack.c.bf16 %v776_v30, %v775_v29  ;;  %v790_v29 = vld [vmem:[#allocation8 + $0x118] sm:$0xff] }
 0x14d   :  { %747 = vmatmul.mubr.f32.vlgmr.msra.gmra.mrb[4].mxu1 %v259_v35  ;;  %v1366_v30 = vpack.c.bf16 %v790_v29, %v789_v41 }
 0x14e   :  { %1237 = vmatpush1.bf16.msra.mxu0 %v1236_v36  ;;  %1333 = vmatpush3.bf16.msra.mxu1 %v1332_v24  ;;  %v778_v36 = vld [vmem:[#allocation8 + $0xb8] sm:$0xff]  ;;  %v787_v24 = vld [vmem:[#allocation8 + $0x100] sm:$0xff] }
 0x14f   :  { %1239 = vmatprep.subr.bf16.mxu0 %v1238_v37  ;;  %1335 = vmatprep.subr.bf16.mxu1 %v1334_v28  ;;  %v1340_v37 = vpack.c.bf16 %v760_v34, %v759_v33  ;;  %v1363_v28 = vpack.c.bf16 %v788_v25, %v787_v24  ;;  %v795_v34 = vld [vmem:[#allocation8 + $0x140] sm:$0xff] }
 0x152   :  { %1241 = vmatpush1.bf16.msra.mxu0 %v1240_v45  ;;  %1337 = vmatpush3.bf16.msra.mxu1 %v1336_v31  ;;  %v780_v45 = vld [vmem:[#allocation8 + $0xc8] sm:$0xff]  ;;  %v793_v31 = vld [vmem:[#allocation8 + $0x130] sm:$0xff] }
 0x153   :  { %1243 = vmatprep.subr.bf16.mxu0 %v1242_v46  ;;  %1339 = vmatprep.subr.bf16.mxu1 %v1338_v32  ;;  %v1344_v46 = vpack.c.bf16 %v762_v43, %v761_v38  ;;  %v1346_v47 = vpack.c.bf16 %v780_v45, %v779_v44  ;;  %v794_v32 = vld [vmem:[#allocation8 + $0x138] sm:$0xff]  ;;  %v799_v38 = vld [vmem:[#allocation8 + $0x160] sm:$0xff]  ;;  %v800_v43 = vld [vmem:[#allocation8 + $0x168] sm:$0xff] }
 0x154   :  { %v1372_v33 = vpack.c.bf16 %v794_v32, %v793_v31  ;;  %v1381_v44 = vpack.c.bf16 %v800_v43, %v799_v38  ;;  %v801_v45 = vld [vmem:[#allocation8 + $0x170] sm:$0xff] }
 0x156   :  { %1245 = vmatpush1.bf16.msra.mxu0 %v1244_v51  ;;  %1341 = vmatpush3.bf16.msra.mxu1 %v1340_v37  ;;  %v782_v51 = vld [vmem:[#allocation8 + $0xd8] sm:$0xff]  ;;  %v797_v37 = vld [vmem:[#allocation8 + $0x150] sm:$0xff] }
 0x157   :  { %1247 = vmatprep.subr.bf16.mxu0 %v1246_v52  ;;  %v1348_v52 = vpack.c.bf16 %v764_v49, %v763_v48  ;;  %v1350_v53 = vpack.c.bf16 %v782_v51, %v781_v50 }
 0x15a   :  { %1249 = vmatpush1.bf16.msra.mxu0 %v1248_v57  ;;  %v784_v57 = vld [vmem:[#allocation8 + $0xe8] sm:$0xff] }
 0x15b   :  { %1251 = vmatprep.subr.bf16.mxu0 %v1250_v58  ;;  %v1352_v58 = vpack.c.bf16 %v766_v55, %v765_v54  ;;  %v1354_v60 = vpack.c.bf16 %v784_v57, %v783_v56 }
 0x15e   :  { %1253 = vmatpush1.bf16.msra.mxu0 %v1252_v1  ;;  %v785_v1 = vld [vmem:[#allocation8 + $0xf0] sm:$0xff] }
 0x15f   :  { %1255 = vmatprep.subr.bf16.mxu0 %v1254_v2  ;;  %v786_v2 = vld [vmem:[#allocation8 + $0xf8] sm:$0xff] }
 0x160   :  { %v1358_v3 = vpack.c.bf16 %v786_v2, %v785_v1 }
 0x162   :  { %1257 = vmatpush1.bf16.msra.mxu0 %v1256_v8  ;;  %v1535_v8 = vmov 0.0|0.0  }
 0x163   :  { %1259 = vmatprep.subr.bf16.mxu0 %v1258_v9 }
 0x166   :  { %1261 = vmatpush1.bf16.msra.mxu0 %v1260_v14 }
 0x167   :  { %1263 = vmatprep.subr.bf16.mxu0 %v1262_v15 }
 0x16a   :  { %1265 = vmatpush1.bf16.msra.mxu0 %v1264_v18 }
 0x16d   :  { %606 = vmatmul.mubr.f32.vlgmr.msra.gmra.mrb[2].mxu0 %v259_v35  ;;  %v777_v35 = vld [vmem:[#allocation8 + $0xb0] sm:$0xff] }
 0x16e   :  { %v1342_v59 = vpack.c.bf16 %v778_v36, %v777_v35  ;;  %v796_v35 = vld [vmem:[#allocation8 + $0x148] sm:$0xff] }
 0x16f   :  { %v1375_v36 = vpack.c.bf16 %v796_v35, %v795_v34 }
 0x170   :  { %1343 = vmatprep.subr.bf16.mxu1 %v1342_v59  ;;  %v798_v59 = vld [vmem:[#allocation8 + $0x158] sm:$0xff] }
 0x171   :  { %1345 = vmatpush3.bf16.msra.mxu1 %v1344_v46  ;;  %v802_v46 = vld [vmem:[#allocation8 + $0x178] sm:$0xff] }
 0x172   :  { %1347 = vmatprep.subr.bf16.mxu1 %v1346_v47  ;;  %v1384_v47 = vpack.c.bf16 %v802_v46, %v801_v45 }
 0x175   :  { %1349 = vmatpush3.bf16.msra.mxu1 %v1348_v52  ;;  %v972_v52 = vld [vmem:[%s1688_s6] ss:$0 sm:$0xff] }
 0x176   :  { %1351 = vmatprep.subr.bf16.mxu1 %v1350_v53 }
 0x179   :  { %1353 = vmatpush3.bf16.msra.mxu1 %v1352_v58 }
 0x17a   :  { %1355 = vmatprep.subr.bf16.mxu1 %v1354_v60 }
 0x17d   :  { %1357 = vmatpush3.bf16.msra.mxu1 %v1356_v63 }
 0x17e   :  { %1359 = vmatprep.subr.bf16.mxu1 %v1358_v3 }
 0x181   :  { %1361 = vmatpush3.bf16.msra.mxu1 %v1360_v7 }
 0x182   :  { %1362 = vmatprep.subr.bf16.mxu1 %v1535_v8 }
 0x200   :  { %v1005_v9 = vpop.f32.mrb[2].mxu1 }
 0x201   :  { %v1006_v10 = vpop.f32.mrb[3].mxu1 }
 0x202   :  { %v1007_v11 = vadd.f32 %v1006_v10, %v1005_v9 }
 0x204   :  { %v679_v16 = vadd.f32 %v1007_v11, %v466_v13 }
 0x220   :  { %v1040_v14 = vpop.f32.mrb[4].mxu1 }
 0x221   :  { %v1041_v15 = vpop.f32.mrb[5].mxu1 }
 0x222   :  { %v1042_v17 = vadd.f32 %v1041_v15, %v1040_v14 }
 0x224   :  { %v749_v18 = vadd.f32 %v1042_v17, %v679_v16 }
 0x226   :  { %v754_v48 = vmax.f32 %v749_v18, 0.0 }
 0x240   :  { %v607_v21 = vpop.f32.mrb[2].mxu0 }
 0x241   :  { %v1386_v22 = vadd.f32 %v607_v21, %v458_v19  ;;  %v609_v23 = vpop.f32.mrb[3].mxu0 }
 0x242   :  { %v1387_v26 = vadd.f32 %v609_v23, %v462_v20 }
 0x243   :  { %v752_v4 = vmax.f32 %v1386_v22, 0.0 }
 0x244   :  { %v753_v27 = vmax.f32 %v1387_v26, 0.0 }
 0x246   :  { %874 = vmatprep.mubr.f32.mxu1 %v753_v27 }
 0x247   :  { %875 = vmatmul.mubr.f32.vlgmr.msra.gmra.mrb[6].mxu1 %v752_v4 }
 0x248   :  { %1364 = vmatpush3.bf16.msra.mxu1 %v1363_v28  ;;  %1127 = vmatprep.mubr.msk.f32.mxu1 %vm1536_vm1, %v1534_v0  ;;  %v1378_v0 = vpack.c.bf16 %v798_v59, %v797_v37 }
 0x249   :  { %1365 = vmatprep.subr.bf16.mxu1 %v1535_v8 }
 0x24c   :  { %1367 = vmatpush3.bf16.msra.mxu1 %v1366_v30 }
 0x24d   :  { %1368 = vmatprep.subr.bf16.mxu1 %v1535_v8 }
 0x250   :  { %1370 = vmatpush3.bf16.msra.mxu1 %v1369_v42 }
 0x251   :  { %1371 = vmatprep.subr.bf16.mxu1 %v1535_v8 }
 0x254   :  { %1373 = vmatpush3.bf16.msra.mxu1 %v1372_v33 }
 0x255   :  { %1374 = vmatprep.subr.bf16.mxu1 %v1535_v8 }
 0x258   :  { %1376 = vmatpush3.bf16.msra.mxu1 %v1375_v36 }
 0x259   :  { %1377 = vmatprep.subr.bf16.mxu1 %v1535_v8 }
 0x25c   :  { %1379 = vmatpush3.bf16.msra.mxu1 %v1378_v0 }
 0x25d   :  { %1380 = vmatprep.subr.bf16.mxu1 %v1535_v8 }
 0x260   :  { %1382 = vmatpush3.bf16.msra.mxu1 %v1381_v44 }
 0x261   :  { %1383 = vmatprep.subr.bf16.mxu1 %v1535_v8 }
 0x264   :  { %1385 = vmatpush3.bf16.msra.mxu1 %v1384_v47 }
 0x267   :  { %1128 = vmatmul.mubr.f32.vlgmr.msra.gmra.mrb[8].mxu1 %v754_v48 }
 0x31a   :  { %v1075_v49 = vpop.f32.mrb[6].mxu1 }
 0x31b   :  { %v1076_v50 = vpop.f32.mrb[7].mxu1 }
 0x31c   :  { %v1077_v51 = vadd.f32 %v1076_v50, %v1075_v49 }
 0x31e   :  { %v877_v53 = vadd.f32 %v1077_v51, %v972_v52 }
 0x33a   :  { %v946_v54 = vpop.f32.mrb[8].mxu1 }
 0x33b   :  { %v947_v55 = vadd.f32 %v946_v54, %v877_v53  ;;  %v1129_v56 = vpop.f32.mrb[9].mxu1 }
 0x33d   :  { %1404 = vtanh.f32 %v947_v55 }
 0x347   :  { %v1405_v57 = vpop.eup %1404 }
 0x348   :  { %v951_v58 = vmul.f32 2.0, %v1405_v57 }
 0x34a   :  { %952 = vst [vmem:[#allocation10] sm:$0xff] %v951_v58 }
 0x34b   :  { %1505 = shalt.err (!%p1502_p8)
}
 0x34c   :  { %s1506_s12 = scalar_lea.hbm %s1689_s7, 128 }
 0x34d   :  { %p1507_p9 = scmp.ne.s32.totalorder %s1689_s7, %s1506_s12  ;;  %p1510_p10 = scmp.lt.u32.totalorder %s1506_s12, %s1689_s7 }
 0x34f   :  { %p1512_p11 = pnand %p1510_p10, %p1507_p9 }
 0x351   :  { %1515 = shalt.err (!%p1512_p11)
}
 0x352   :  { %962 = dma.vmem_to_hbm [thread:$0]  %s960_s9, 128, %s1689_s7, [#allocation4]  }
 0x353   :  { %1522 = dma.done.wait [#allocation4], 128  }
 0x354   :  { %1523 = vsyncadd [#allocation4], 4294967168 }
 0x355   :  { %966 = vsyncpa [#allocation3], 1 }
 0x356   :  { %967 = vsyncpa [#allocation6], 1 }
 0x357   :  { %968 = vsyncpa [#allocation9], 1 }
 0x358   :  { %969 = vsyncpa [#allocation4], 1 }

</bundles_post_ra>
